<compile_context>
chip_gen: v6e
topology: v6e:2x2x1
jax: 0.10.0
libtpu: 0.0.40
codegen_flags: <defaults>
</compile_context>

<pallas_src>
import sys

import jax
import jax.numpy as jnp
from jax.experimental import pallas as pl
from jax.experimental.pallas import tpu as pltpu

_EPS = float(sys.float_info.epsilon)
_LANE = 128
_VMEM_LIMIT = 32 << 20  # safe on v5e / v6e / v7x


# ---------------------------------------------------------------------------
# Kernels
# ---------------------------------------------------------------------------
def _fused_reduce_kernel(inp_ref, trg_ref, out_ref, si_acc, st_acc, d_acc, sums_smem):
    """grid = (2, n_tiles).  Pass 0: global sums.  Pass 1: sum of d."""
    p = pl.program_id(0)              # 0 = sums pass, 1 = KL pass
    i = pl.program_id(1)              # tile index
    last = pl.num_programs(1) - 1

    @pl.when((p == 0) & (i == 0))
    def _():
        si_acc[...] = jnp.zeros_like(si_acc)
        st_acc[...] = jnp.zeros_like(st_acc)

    @pl.when(p == 0)
    def _():
        x = inp_ref[...].astype(jnp.float32)
        t = trg_ref[...].astype(jnp.float32)
        si_acc[...] += jnp.sum(x, axis=0, keepdims=True)
        st_acc[...] += jnp.sum(t, axis=0, keepdims=True)

    @pl.when((p == 0) & (i == last))
    def _():
        sums_smem[0] = jnp.sum(si_acc[...])
        sums_smem[1] = jnp.sum(st_acc[...])
        d_acc[...] = jnp.zeros_like(d_acc)

    @pl.when(p == 1)
    def _():
        inv_si = 1.0 / sums_smem[0]
        inv_st = 1.0 / sums_smem[1]
        x = inp_ref[...].astype(jnp.float32) * inv_si
        t = trg_ref[...].astype(jnp.float32) * inv_st
        d = t * jnp.log(_EPS + t / (x + _EPS))
        d_acc[...] += jnp.sum(d, axis=0, keepdims=True)

    @pl.when((p == 1) & (i == last))
    def _():
        out_ref[0, 0] = jnp.sum(d_acc[...])


def _sums_kernel(inp_ref, trg_ref, sums_ref, si_acc, st_acc):
    """Streaming 'none' path, pass 1: global sum(inp), sum(trg)."""
    i = pl.program_id(0)

    @pl.when(i == 0)
    def _():
        si_acc[...] = jnp.zeros_like(si_acc)
        st_acc[...] = jnp.zeros_like(st_acc)

    si_acc[...] += jnp.sum(inp_ref[...].astype(jnp.float32), axis=0, keepdims=True)
    st_acc[...] += jnp.sum(trg_ref[...].astype(jnp.float32), axis=0, keepdims=True)

    @pl.when(i == pl.num_programs(0) - 1)
    def _():
        sums_ref[0, 0] = jnp.sum(si_acc[...])
        sums_ref[0, 1] = jnp.sum(st_acc[...])


def _none_tile_kernel(sums_ref, inp_ref, trg_ref, d_ref):
    """Streaming 'none' path, pass 2: elementwise d per tile (parallel)."""
    inv_si = 1.0 / sums_ref[0, 0]
    inv_st = 1.0 / sums_ref[0, 1]
    x = inp_ref[...].astype(jnp.float32) * inv_si
    t = trg_ref[...].astype(jnp.float32) * inv_st
    d_ref[...] = t * jnp.log(_EPS + t / (x + _EPS))


def _none_resident_kernel(inp_ref, trg_ref, d_ref):
    """'none' reduction, whole problem resident in VMEM: single pass."""
    x = inp_ref[...].astype(jnp.float32)
    t = trg_ref[...].astype(jnp.float32)
    x = x * (1.0 / jnp.sum(x))
    t = t * (1.0 / jnp.sum(t))
    d_ref[...] = t * jnp.log(_EPS + t / (x + _EPS))


# ---------------------------------------------------------------------------
# Wrapper
# ---------------------------------------------------------------------------
def kld_loss(inp, trg, reduction="sum", *, max_tile_rows=4096, resident_max_rows=8192):
    if inp.shape != trg.shape:
        raise ValueError("inp and trg must have identical shapes")
    if reduction not in ("sum", "mean", "batchmean", "none"):
        raise ValueError(f'Reduction method "{reduction}" invalid!')

    orig_shape = inp.shape
    batch = orig_shape[0] if len(orig_shape) > 0 else 1
    n_elems = 1
    for s in orig_shape:
        n_elems *= s

    # Keep TPU-friendly storage dtypes; the upcast to f32 happens in-kernel.
    if (inp.dtype != trg.dtype) or (
        inp.dtype not in (jnp.float32, jnp.bfloat16, jnp.float16)
    ):
        inp = inp.astype(jnp.float32)
        trg = trg.astype(jnp.float32)
    sub = {4: 8, 2: 16, 1: 32}.get(inp.dtype.itemsize, 8)  # sublane granularity

    rows = -(-n_elems // _LANE)
    if rows <= resident_max_rows:
        tile_rows = -(-rows // sub) * sub          # single resident tile
        n_tiles = 1
    else:
        tile_rows = max(sub, (max_tile_rows // sub) * sub)
        n_tiles = -(-rows // tile_rows)
    padded_rows = n_tiles * tile_rows
    pad = padded_rows * _LANE - n_elems

    flat_i = inp.reshape(-1)
    flat_t = trg.reshape(-1)
    if pad:  # zero pad is exact: trg == 0 => d == 0, and 0 adds nothing to sums
        flat_i = jnp.pad(flat_i, (0, pad))
        flat_t = jnp.pad(flat_t, (0, pad))
    x2 = flat_i.reshape(padded_rows, _LANE)
    t2 = flat_t.reshape(padded_rows, _LANE)

    tile2_spec = pl.BlockSpec((tile_rows, _LANE), lambda p, i: (i, 0))
    tile1_spec = pl.BlockSpec((tile_rows, _LANE), lambda i: (i, 0))
    smem_spec = pl.BlockSpec(memory_space=pltpu.SMEM)

    # ---------------- sum-style reductions: one fused two-pass call ----------
    if reduction != "none":
        total = pl.pallas_call(
            _fused_reduce_kernel,
            out_shape=jax.ShapeDtypeStruct((1, 1), jnp.float32),
            grid=(2, n_tiles),
            in_specs=[tile2_spec, tile2_spec],
            out_specs=smem_spec,
            scratch_shapes=[
                pltpu.VMEM((1, _LANE), jnp.float32),   # sum(inp) partials
                pltpu.VMEM((1, _LANE), jnp.float32),   # sum(trg) partials
                pltpu.VMEM((1, _LANE), jnp.float32),   # sum(d)   partials
                pltpu.SMEM((2,), jnp.float32),         # global sums
            ],
            compiler_params=pltpu.CompilerParams(
                dimension_semantics=("arbitrary", "arbitrary"),
                vmem_limit_bytes=_VMEM_LIMIT),
        )(x2, t2)[0, 0]

        if reduction == "sum":
            return total
        if reduction == "mean":
            return total / jnp.float32(n_elems)
        return total / jnp.float32(batch)              # batchmean

    # ---------------- 'none' reduction ---------------------------------------
    if n_tiles == 1:
        d2 = pl.pallas_call(
            _none_resident_kernel,
            out_shape=jax.ShapeDtypeStruct((padded_rows, _LANE), jnp.float32),
            grid=(1,),
            in_specs=[tile1_spec, tile1_spec],
            out_specs=pl.BlockSpec((tile_rows, _LANE), lambda i: (i, 0)),
            compiler_params=pltpu.CompilerParams(
                dimension_semantics=("arbitrary",),
                vmem_limit_bytes=_VMEM_LIMIT),
        )(x2, t2)
    else:
        sums = pl.pallas_call(
            _sums_kernel,
            out_shape=jax.ShapeDtypeStruct((1, 2), jnp.float32),
            grid=(n_tiles,),
            in_specs=[tile1_spec, tile1_spec],
            out_specs=smem_spec,
            scratch_shapes=[pltpu.VMEM((1, _LANE), jnp.float32),
                            pltpu.VMEM((1, _LANE), jnp.float32)],
            compiler_params=pltpu.CompilerParams(
                dimension_semantics=("arbitrary",),
                vmem_limit_bytes=_VMEM_LIMIT),
        )(x2, t2)
        d2 = pl.pallas_call(
            _none_tile_kernel,
            out_shape=jax.ShapeDtypeStruct((padded_rows, _LANE), jnp.float32),
            grid=(n_tiles,),
            in_specs=[smem_spec, tile1_spec, tile1_spec],
            out_specs=pl.BlockSpec((tile_rows, _LANE), lambda i: (i, 0)),
            compiler_params=pltpu.CompilerParams(
                dimension_semantics=("parallel",),     # elementwise: megacore OK
                vmem_limit_bytes=_VMEM_LIMIT),
        )(sums, x2, t2)

    return d2.reshape(-1)[:n_elems].reshape(orig_shape)


# ---------------------------------------------------------------------------
# Reference (pure JAX) for verification
# ---------------------------------------------------------------------------
def _kld_ref(inp, trg, reduction="sum"):
    inp = inp.astype(jnp.float32) / jnp.sum(inp.astype(jnp.float32))
    trg = trg.astype(jnp.float32) / jnp.sum(trg.astype(jnp.float32))
    d = trg * jnp.log(_EPS + trg / (inp + _EPS))
    if reduction == "sum":
        return jnp.sum(d)
    if reduction == "mean":
        return jnp.mean(d)
    if reduction == "batchmean":
        return jnp.mean(jnp.sum(d.reshape(d.shape[0], -1), axis=1))
    if reduction == "none":
        return d
    raise ValueError(reduction)


if __name__ == "__main__":
    key = jax.random.PRNGKey(0)
    k1, k2 = jax.random.split(key)
    # NCHW, saliency-map-like positive inputs
    x = jax.random.uniform(k1, (2, 4, 16, 16), dtype=jnp.float32) + 0.1
    t = jax.random.uniform(k2, (2, 4, 16, 16), dtype=jnp.float32) + 0.1

    # default reduction 'sum' — fused single-tile (VMEM-resident) path
    loss = jax.block_until_ready(kld_loss(x, t, reduction="sum"))
    ref = _kld_ref(x, t, reduction="sum")
    assert jnp.allclose(loss, ref, rtol=1e-5, atol=1e-6), (loss, ref)

    # other reductions on the default path
    for red in ("mean", "batchmean", "none"):
        out = jax.block_until_ready(kld_loss(x, t, reduction=red))
        ref_r = _kld_ref(x, t, reduction=red)
        assert jnp.allclose(out, ref_r, rtol=1e-5, atol=1e-6), red

    # force the multi-tile streaming path (same small data, tiny tiles)
    for red in ("sum", "none"):
        out = jax.block_until_ready(
            kld_loss(x, t, reduction=red, max_tile_rows=8, resident_max_rows=4))
        ref_r = _kld_ref(x, t, reduction=red)
        assert jnp.allclose(out, ref_r, rtol=1e-5, atol=1e-6), ("stream", red)

    # bf16 storage: DMA'd as bf16, upcast inside the kernel
    xb, tb = x.astype(jnp.bfloat16), t.astype(jnp.bfloat16)
    out_b = jax.block_until_ready(kld_loss(xb, tb, reduction="sum"))
    ref_b = _kld_ref(xb, tb, reduction="sum")
    assert jnp.allclose(out_b, ref_b, rtol=5e-5, atol=1e-6), (out_b, ref_b)

    print("KERNEL_OK")
</pallas_src>

<mosaic_0001>
module attributes {stable_mosaic.version = 11 : i64} {
  func.func @_fused_reduce_kernel(%arg0: i32, %arg1: i32, %arg2: memref<16x128xf32, #tpu.memory_space<vmem>>, %arg3: memref<16x128xf32, #tpu.memory_space<vmem>>, %arg4: memref<1x1xf32, #tpu.memory_space<smem>>, %arg5: memref<1x128xf32, #tpu.memory_space<vmem>>, %arg6: memref<1x128xf32, #tpu.memory_space<vmem>>, %arg7: memref<1x128xf32, #tpu.memory_space<vmem>>, %arg8: memref<2xf32, #tpu.memory_space<smem>>) attributes {dimension_semantics = [#tpu.dimension_semantics<arbitrary>, #tpu.dimension_semantics<arbitrary>], iteration_bounds = array<i64: 2, 1>, scalar_prefetch = 0 : i64, scratch_operands = 4 : i64, tpu.core_type = #tpu.core_type<tc>, window_params = [{transform_indices = @transform_0, window_bounds = array<i64: 16, 128>}, {transform_indices = @transform_1, window_bounds = array<i64: 16, 128>}, {transform_indices = @transform_2, window_bounds = array<i64: 1, 1>}]} {
    %c0_i32 = arith.constant 0 : i32
    %0 = arith.cmpi eq, %arg0, %c0_i32 : i32
    %c0_i32_0 = arith.constant 0 : i32
    %1 = arith.cmpi eq, %arg1, %c0_i32_0 : i32
    %2 = arith.andi %0, %1 : i1
    %3 = arith.extui %2 : i1 to i32
    %c0_i32_1 = arith.constant 0 : i32
    %4 = arith.cmpi ne, %3, %c0_i32_1 : i32
    scf.if %4 {
      %cst = arith.constant 0.000000e+00 : f32
      %21 = vector.broadcast %cst : f32 to vector<1x128xf32>
      %c0 = arith.constant 0 : index
      %c0_11 = arith.constant 0 : index
      %22 = vector.load %arg5[%c0, %c0_11] : memref<1x128xf32, #tpu.memory_space<vmem>>, vector<1x128xf32>
      tpu.vector_store %arg5[%c0, %c0_11], %21 {strides = array<i32>} : memref<1x128xf32, #tpu.memory_space<vmem>>, vector<1x128xf32>,
      %cst_12 = arith.constant 0.000000e+00 : f32
      %23 = vector.broadcast %cst_12 : f32 to vector<1x128xf32>
      %c0_13 = arith.constant 0 : index
      %c0_14 = arith.constant 0 : index
      %24 = vector.load %arg6[%c0_13, %c0_14] : memref<1x128xf32, #tpu.memory_space<vmem>>, vector<1x128xf32>
      tpu.vector_store %arg6[%c0_13, %c0_14], %23 {strides = array<i32>} : memref<1x128xf32, #tpu.memory_space<vmem>>, vector<1x128xf32>,
    } else {
    }
    %c0_i32_2 = arith.constant 0 : i32
    %5 = arith.cmpi eq, %arg0, %c0_i32_2 : i32
    %6 = arith.extui %5 : i1 to i32
    %c0_i32_3 = arith.constant 0 : i32
    %7 = arith.cmpi ne, %6, %c0_i32_3 : i32
    scf.if %7 {
      %c0 = arith.constant 0 : index
      %c0_11 = arith.constant 0 : index
      %21 = vector.load %arg2[%c0, %c0_11] : memref<16x128xf32, #tpu.memory_space<vmem>>, vector<16x128xf32>
      %c0_12 = arith.constant 0 : index
      %c0_13 = arith.constant 0 : index
      %22 = vector.load %arg3[%c0_12, %c0_13] : memref<16x128xf32, #tpu.memory_space<vmem>>, vector<16x128xf32>
      %c0_14 = arith.constant 0 : index
      %c0_15 = arith.constant 0 : index
      %23 = vector.load %arg5[%c0_14, %c0_15] : memref<1x128xf32, #tpu.memory_space<vmem>>, vector<1x128xf32>
      %cst = arith.constant dense<0.000000e+00> : vector<128xf32>
      %24 = vector.multi_reduction <add>, %21, %cst [0] : vector<16x128xf32> to vector<128xf32>
      %25 = vector.shape_cast %24 : vector<128xf32> to vector<1x128xf32>
      %26 = arith.addf %23, %25 : vector<1x128xf32>
      %c0_16 = arith.constant 0 : index
      %c0_17 = arith.constant 0 : index
      %27 = vector.load %arg5[%c0_16, %c0_17] : memref<1x128xf32, #tpu.memory_space<vmem>>, vector<1x128xf32>
      tpu.vector_store %arg5[%c0_16, %c0_17], %26 {strides = array<i32>} : memref<1x128xf32, #tpu.memory_space<vmem>>, vector<1x128xf32>,
      %c0_18 = arith.constant 0 : index
      %c0_19 = arith.constant 0 : index
      %28 = vector.load %arg6[%c0_18, %c0_19] : memref<1x128xf32, #tpu.memory_space<vmem>>, vector<1x128xf32>
      %cst_20 = arith.constant dense<0.000000e+00> : vector<128xf32>
      %29 = vector.multi_reduction <add>, %22, %cst_20 [0] : vector<16x128xf32> to vector<128xf32>
      %30 = vector.shape_cast %29 : vector<128xf32> to vector<1x128xf32>
      %31 = arith.addf %28, %30 : vector<1x128xf32>
      %c0_21 = arith.constant 0 : index
      %c0_22 = arith.constant 0 : index
      %32 = vector.load %arg6[%c0_21, %c0_22] : memref<1x128xf32, #tpu.memory_space<vmem>>, vector<1x128xf32>
      tpu.vector_store %arg6[%c0_21, %c0_22], %31 {strides = array<i32>} : memref<1x128xf32, #tpu.memory_space<vmem>>, vector<1x128xf32>,
    } else {
    }
    %c0_i32_4 = arith.constant 0 : i32
    %8 = arith.cmpi eq, %arg0, %c0_i32_4 : i32
    %c0_i32_5 = arith.constant 0 : i32
    %9 = arith.cmpi eq, %arg1, %c0_i32_5 : i32
    %10 = arith.andi %8, %9 : i1
    %11 = arith.extui %10 : i1 to i32
    %c0_i32_6 = arith.constant 0 : i32
    %12 = arith.cmpi ne, %11, %c0_i32_6 : i32
    scf.if %12 {
      %c0 = arith.constant 0 : index
      %c0_11 = arith.constant 0 : index
      %21 = vector.load %arg5[%c0, %c0_11] : memref<1x128xf32, #tpu.memory_space<vmem>>, vector<1x128xf32>
      %22 = vector.shape_cast %21 : vector<1x128xf32> to vector<1x1x128xf32>
      %cst = arith.constant dense<0.000000e+00> : vector<1xf32>
      %23 = vector.multi_reduction <add>, %22, %cst [1, 2] : vector<1x1x128xf32> to vector<1xf32>
      %24 = vector.shape_cast %23 : vector<1xf32> to vector<1x1x1xf32>
      %25 = vector.extract %24[0, 0, 0] : f32 from vector<1x1x1xf32>
      %c0_12 = arith.constant 0 : index
      %26 = memref.load %arg8[%c0_12] : memref<2xf32, #tpu.memory_space<smem>>
      memref.store %25, %arg8[%c0_12] : memref<2xf32, #tpu.memory_space<smem>>
      %c0_13 = arith.constant 0 : index
      %c0_14 = arith.constant 0 : index
      %27 = vector.load %arg6[%c0_13, %c0_14] : memref<1x128xf32, #tpu.memory_space<vmem>>, vector<1x128xf32>
      %28 = vector.shape_cast %27 : vector<1x128xf32> to vector<1x1x128xf32>
      %cst_15 = arith.constant dense<0.000000e+00> : vector<1xf32>
      %29 = vector.multi_reduction <add>, %28, %cst_15 [1, 2] : vector<1x1x128xf32> to vector<1xf32>
      %30 = vector.shape_cast %29 : vector<1xf32> to vector<1x1x1xf32>
      %31 = vector.extract %30[0, 0, 0] : f32 from vector<1x1x1xf32>
      %c1 = arith.constant 1 : index
      %32 = memref.load %arg8[%c1] : memref<2xf32, #tpu.memory_space<smem>>
      memref.store %31, %arg8[%c1] : memref<2xf32, #tpu.memory_space<smem>>
      %cst_16 = arith.constant 0.000000e+00 : f32
      %33 = vector.broadcast %cst_16 : f32 to vector<1x128xf32>
      %c0_17 = arith.constant 0 : index
      %c0_18 = arith.constant 0 : index
      %34 = vector.load %arg7[%c0_17, %c0_18] : memref<1x128xf32, #tpu.memory_space<vmem>>, vector<1x128xf32>
      tpu.vector_store %arg7[%c0_17, %c0_18], %33 {strides = array<i32>} : memref<1x128xf32, #tpu.memory_space<vmem>>, vector<1x128xf32>,
    } else {
    }
    %c1_i32 = arith.constant 1 : i32
    %13 = arith.cmpi eq, %arg0, %c1_i32 : i32
    %14 = arith.extui %13 : i1 to i32
    %c0_i32_7 = arith.constant 0 : i32
    %15 = arith.cmpi ne, %14, %c0_i32_7 : i32
    scf.if %15 {
      %c0 = arith.constant 0 : index
      %21 = memref.load %arg8[%c0] : memref<2xf32, #tpu.memory_space<smem>>
      %cst = arith.constant 1.000000e+00 : f32
      %22 = arith.divf %cst, %21 : f32
      %c1 = arith.constant 1 : index
      %23 = memref.load %arg8[%c1] : memref<2xf32, #tpu.memory_space<smem>>
      %cst_11 = arith.constant 1.000000e+00 : f32
      %24 = arith.divf %cst_11, %23 : f32
      %c0_12 = arith.constant 0 : index
      %c0_13 = arith.constant 0 : index
      %25 = vector.load %arg2[%c0_12, %c0_13] : memref<16x128xf32, #tpu.memory_space<vmem>>, vector<16x128xf32>
      %26 = vector.broadcast %22 : f32 to vector<16x128xf32>
      %27 = arith.mulf %25, %26 : vector<16x128xf32>
      %c0_14 = arith.constant 0 : index
      %c0_15 = arith.constant 0 : index
      %28 = vector.load %arg3[%c0_14, %c0_15] : memref<16x128xf32, #tpu.memory_space<vmem>>, vector<16x128xf32>
      %29 = vector.broadcast %24 : f32 to vector<16x128xf32>
      %30 = arith.mulf %28, %29 : vector<16x128xf32>
      %cst_16 = arith.constant 2.22044605E-16 : f32
      %31 = vector.broadcast %cst_16 : f32 to vector<16x128xf32>
      %32 = arith.addf %27, %31 : vector<16x128xf32>
      %33 = arith.divf %30, %32 : vector<16x128xf32>
      %cst_17 = arith.constant 2.22044605E-16 : f32
      %34 = vector.broadcast %cst_17 : f32 to vector<16x128xf32>
      %35 = arith.addf %34, %33 : vector<16x128xf32>
      %36 = math.log %35 : vector<16x128xf32>
      %37 = arith.mulf %30, %36 : vector<16x128xf32>
      %c0_18 = arith.constant 0 : index
      %c0_19 = arith.constant 0 : index
      %38 = vector.load %arg7[%c0_18, %c0_19] : memref<1x128xf32, #tpu.memory_space<vmem>>, vector<1x128xf32>
      %cst_20 = arith.constant dense<0.000000e+00> : vector<128xf32>
      %39 = vector.multi_reduction <add>, %37, %cst_20 [0] : vector<16x128xf32> to vector<128xf32>
      %40 = vector.shape_cast %39 : vector<128xf32> to vector<1x128xf32>
      %41 = arith.addf %38, %40 : vector<1x128xf32>
      %c0_21 = arith.constant 0 : index
      %c0_22 = arith.constant 0 : index
      %42 = vector.load %arg7[%c0_21, %c0_22] : memref<1x128xf32, #tpu.memory_space<vmem>>, vector<1x128xf32>
      tpu.vector_store %arg7[%c0_21, %c0_22], %41 {strides = array<i32>} : memref<1x128xf32, #tpu.memory_space<vmem>>, vector<1x128xf32>,
    } else {
    }
    %c1_i32_8 = arith.constant 1 : i32
    %16 = arith.cmpi eq, %arg0, %c1_i32_8 : i32
    %c0_i32_9 = arith.constant 0 : i32
    %17 = arith.cmpi eq, %arg1, %c0_i32_9 : i32
    %18 = arith.andi %16, %17 : i1
    %19 = arith.extui %18 : i1 to i32
    %c0_i32_10 = arith.constant 0 : i32
    %20 = arith.cmpi ne, %19, %c0_i32_10 : i32
    scf.if %20 {
      %c0 = arith.constant 0 : index
      %c0_11 = arith.constant 0 : index
      %21 = vector.load %arg7[%c0, %c0_11] : memref<1x128xf32, #tpu.memory_space<vmem>>, vector<1x128xf32>
      %22 = vector.shape_cast %21 : vector<1x128xf32> to vector<1x1x128xf32>
      %cst = arith.constant dense<0.000000e+00> : vector<1xf32>
      %23 = vector.multi_reduction <add>, %22, %cst [1, 2] : vector<1x1x128xf32> to vector<1xf32>
      %24 = vector.shape_cast %23 : vector<1xf32> to vector<1x1x1xf32>
      %25 = vector.extract %24[0, 0, 0] : f32 from vector<1x1x1xf32>
      %c0_12 = arith.constant 0 : index
      %c0_13 = arith.constant 0 : index
      %26 = memref.load %arg4[%c0_12, %c0_13] : memref<1x1xf32, #tpu.memory_space<smem>>
      memref.store %25, %arg4[%c0_12, %c0_13] : memref<1x1xf32, #tpu.memory_space<smem>>
    } else {
    }
    return
  }
  func.func @transform_0(%arg0: i32, %arg1: i32) -> (i32, i32) {
    %c0_i32 = arith.constant 0 : i32
    %c0_i32_0 = arith.constant 0 : i32
    return %arg1, %c0_i32 : i32, i32
  }
  func.func @transform_1(%arg0: i32, %arg1: i32) -> (i32, i32) {
    %c0_i32 = arith.constant 0 : i32
    %c0_i32_0 = arith.constant 0 : i32
    return %arg1, %c0_i32 : i32, i32
  }
  func.func @transform_2(%arg0: i32, %arg1: i32) -> (i32, i32) {
    %c0_i32 = arith.constant 0 : i32
    %c0_i32_0 = arith.constant 0 : i32
    %c0_i32_1 = arith.constant 0 : i32
    return %c0_i32, %c0_i32_0 : i32, i32
  }
}

</mosaic_0001>

<bundles_post_ra>
// kernel: tpu_custom_call.1
= control target key start
LH: loop header
LB: loop body
LE: loop exit
PB: predicated region body
PF: predicated region fallthrough
CT: control target
= control target key end

     0   :  { %7 = vsyncpa [#allocation7], 0  ;;  %s674_s0 = inlined_call_operand.hbm [shape: f32[16,128], index: 0, kind: input, shape index: {}]   ;;  %s675_s1 = inlined_call_operand.hbm [shape: f32[16,128], index: 1, kind: input, shape index: {}]   ;;  %s676_s2 = inlined_call_operand.hbm [shape: f32[1,1], index: 2, kind: output, shape index: {}]  }
   0x1   :  { %8 = vsyncpa [#allocation10], 0 }
   0x2   :  { %9 = vsyncpa [#allocation8], 0  ;;  %s583_s9 = smov 0   ;;  %s585_s10 = smov 0  }
   0x3   :  { %s587_s11 = smov 0  }
   0x4 LB: > { %s367_s12 = sadd.s32 4294967295, %s559_s11   ;;  %s27_s13 = sadd.s32 1, %s555_s10  ;;  %s559_s11 = sphi %s587_s11, %s15_s11   ;;  %s555_s10 = sphi %s585_s10, %s681_s10   ;;  %s551_s9 = sphi %s583_s9, %s680_s9  }
   0x5   : > { %p29_p0 = scmp.ge.s32.totalorder %s27_s13, 2  ;;  %p368_p1 = scmp.ge.s32.totalorder %s559_s11, 1 }
   0x6   : > { %p105_p2 = scmp.lt.s32.totalorder %s559_s11, 3  ;;  %p610_p4 = scmp.eq.s32.totalorder %s367_s12, 0 }
   0x7   : > { %s683_s13 = smov (%p29_p0, %s27_s13), 0  ;;  %s561_s16 = smov [#allocation6]  }
   0x8   : > { %p604_p3 = pnand %p368_p1, %p105_p2  ;;  %s120_s17 = sshll.u32 %s561_s16, 4  ;;  %s121_s17 = int_to_ptr.vmem [resolvable:$true] %s120_s17 }
   0x9   : > { %s562_s19 = smov [#allocation9]   ;;  %s474_s21 = scalar_lea.vmem %s121_s17, 256 }
   0xa   : > { %p407_p5 = pneg %p604_p3  ;;  %s136_s20 = sshll.u32 %s562_s19, 4  ;;  %s137_s20 = int_to_ptr.vmem [resolvable:$true] %s136_s20 }
   0xb   : > { %p475_p8 = scmp.ne.s32.totalorder %s121_s17, %s474_s21  ;;  %p482_p11 = scmp.lt.s32.totalorder %s121_s17, %s121_s17 }
   0xc   : > { %p618_p6 = pnand %p610_p4, %p407_p5  ;;  %p483_p12 = scmp.lt.s32.totalorder %s474_s21, %s474_s21 }
   0xe   : > { %p465_p7 = pneg %p618_p6  ;;  %p484_p13 = por %p483_p12, %p482_p11 }
  0x10   : > { %p477_p9 = pnand %p475_p8, %p465_p7 }
  0x12   : > { %p478_p10 = pneg %p477_p9 }
  0x14   : > { %p485_p0 = pnand %p484_p13, %p478_p10 }
  0x16   : > { %488 = shalt.err (!%p485_p0)
}
  0x17   : > { %s563_s22 = smov 128   ;;  %s564_s23 = smov 8  }
  0x18   : > { %410 = dma.hbm_to_vmem [thread:$0]  (!%p618_p6), %s674_s0, 256, %s121_s17, [#allocation7], %s563_s22, %s563_s22, %s564_s23  }
  0x19   : > { %s500_s26 = scalar_lea.vmem %s137_s20, 256  ;;  %p508_p8 = scmp.lt.s32.totalorder %s137_s20, %s137_s20 }
  0x1a   : > { %p501_p1 = scmp.ne.s32.totalorder %s137_s20, %s500_s26  ;;  %p509_p9 = scmp.lt.s32.totalorder %s500_s26, %s500_s26 }
  0x1c   : > { %p503_p2 = pnand %p501_p1, %p465_p7  ;;  %p510_p11 = por %p509_p9, %p508_p8 }
  0x1e   : > { %p504_p5 = pneg %p503_p2 }
  0x20   : > { %p511_p10 = pnand %p510_p11, %p504_p5 }
  0x22   : > { %514 = shalt.err (!%p511_p10)
}
  0x23   : > { %413 = dma.hbm_to_vmem [thread:$0]  (!%p618_p6), %s675_s1, 256, %s137_s20, [#allocation10], %s563_s22, %s563_s22, %s564_s23  }
  0x24   : > { %152 = sbr.rel (%p604_p3) target bundleno = 635 (0x27b), region = 28 }
  0x29   : > { %538 = dma.done.wait (%p610_p4), [#allocation7], 256  }
  0x2a   : > { %540 = vsyncadd (%p610_p4), [#allocation7], 4294967040 }
  0x2b   : > { %542 = dma.done.wait (%p610_p4), [#allocation10], 256  }
  0x2c   : > { %544 = vsyncadd (%p610_p4), [#allocation10], 4294967040  ;;  %p170_p7 = scmp.eq.s32.totalorder %s551_s9, 0 }
  0x2d   : > { %v565_v0 = vmov (%p170_p7), 0.0  }
  0x2e   : > { %175 = sbr.rel (!%p170_p7) target bundleno = 51 (0x33), region = 40  ;;  %176 = vst [vmem:[#allocation2] sm:$0x1] (%p170_p7), %v565_v0  ;;  %177 = vst [vmem:[#allocation3] sm:$0x1] (%p170_p7), %v565_v0 }
  0x33 PF: > { %p375_p3 = scmp.ne.s32.totalorder %s551_s9, 0 }
  0x35   : > { %180 = sbr.rel (%p375_p3) target bundleno = 77 (0x4d), region = 44 }
  0x3a   : > { %v181_v1 = vld [vmem:[#allocation6] sm:$0xff]  ;;  %v182_v2 = vld [vmem:[#allocation6 + $0x8] sm:$0xff]  ;;  %v183_v4 = vld [vmem:[#allocation9] sm:$0xff] }
  0x3b   : > { %v186_v3 = vadd.f32 %v182_v2, %v181_v1  ;;  %v184_v5 = vld [vmem:[#allocation9 + $0x8] sm:$0xff] }
  0x3c   : > { %v196_v6 = vadd.f32 %v184_v5, %v183_v4  ;;  %v185_v16 = vld [vmem:[#allocation2] sm:$0x1]  ;;  %v195_v19 = vld [vmem:[#allocation3] sm:$0x1] }
  0x3d   : > { %v187_v7 = vrot.slane %v186_v3, 4 }
  0x3e   : > { %v197_v8 = vrot.slane %v196_v6, 4 }
  0x3f   : > { %v188_v9 = vadd.f32 %v187_v7, %v186_v3 }
  0x40   : > { %v198_v10 = vadd.f32 %v197_v8, %v196_v6 }
  0x41   : > { %v189_v11 = vrot.slane %v188_v9, 2 }
  0x42   : > { %v199_v12 = vrot.slane %v198_v10, 2 }
  0x43   : > { %v190_v13 = vadd.f32 %v189_v11, %v188_v9 }
  0x44   : > { %v200_v14 = vadd.f32 %v199_v12, %v198_v10 }
  0x45   : > { %v191_v15 = vrot.slane %v190_v13, 1 }
  0x46   : > { %v201_v17 = vrot.slane %v200_v14, 1 }
  0x47   : > { %v192_v18 = vadd.f32 %v191_v15, %v190_v13 }
  0x48   : > { %v202_v20 = vadd.f32 %v201_v17, %v200_v14 }
  0x49   : > { %v193_v21 = vadd.f32 %v192_v18, %v185_v16 }
  0x4a   : > { %v203_v22 = vadd.f32 %v202_v20, %v195_v19 }
  0x4b   : > { %194 = vst [vmem:[#allocation2] sm:$0x1] %v193_v21 }
  0x4c   : > { %204 = vst [vmem:[#allocation3] sm:$0x1] %v203_v22 }
  0x4d PF: > { %206 = sbr.rel (!%p170_p7) target bundleno = 289 (0x121), region = 48  ;;  %vm208_vm0 = vcmask (%p170_p7), 1040384   ;;  %v566_v27 = vmov (%p170_p7), 0.0  }
  0x4e   : > { %234 = vst [vmem:[#allocation4] sm:$0x1] (%p170_p7), %v566_v27 }
  0x52   : > { %v207_v23 = vld [vmem:[#allocation2] sm:$0x1] }
  0x53   : > { %v221_v24 = vld [vmem:[#allocation3] sm:$0x1]  ;;  %v209_v25 = vsel %vm208_vm0, %v207_v23, 0.0 }
  0x54   : > { %210 = vadd.xlane.f32.xlu0 %v209_v25  ;;  %v222_v26 = vsel %vm208_vm0, %v221_v24, 0.0 }
  0x58   : > { %223 = vadd.xlane.f32.xlu0 %v222_v26 }
  0xdd   : > { %v211_v28 = vpop.xlane.xlu0 %210 }
  0xde   : > { %v212_v29 = vrot.slane %v211_v28, 4 }
  0xe0   : > { %v213_v30 = vadd.f32 %v212_v29, %v211_v28 }
  0xe1   : > { %v224_v31 = vpop.xlane.xlu0 %223 }
  0xe2   : > { %v214_v32 = vrot.slane %v213_v30, 2  ;;  %v225_v33 = vrot.slane %v224_v31, 4 }
  0xe4   : > { %v226_v34 = vadd.f32 %v225_v33, %v224_v31  ;;  %v215_v35 = vadd.f32 %v214_v32, %v213_v30 }
  0xe6   : > { %v227_v36 = vrot.slane %v226_v34, 2  ;;  %v216_v37 = vrot.slane %v215_v35, 1 }
  0xe8   : > { %v228_v38 = vadd.f32 %v227_v36, %v226_v34  ;;  %v217_v39 = vadd.f32 %v216_v37, %v215_v35 }
  0xea   : > { %385 = vpush %v217_v39  ;;  %v229_v40 = vrot.slane %v228_v38, 1 }
  0xec   : > { %v230_v41 = vadd.f32 %v229_v40, %v228_v38 }
  0xee   : > { %387 = vpush %v230_v41 }
 0x11b   : > { %s386_s29 = spop %385 }
 0x11c   : > { %220 = sst [smem:[#allocation5]] %s386_s29 }
 0x11f   : > { %s388_s30 = spop %387 }
 0x120   : > { %233 = sst [smem:[#allocation5 + $0x1]] %s388_s30 }
 0x121 PF: > { %p235_p4 = scmp.eq.s32.totalorder %s551_s9, 1  ;;  %p376_p6 = scmp.ne.s32.totalorder %s551_s9, 1 }
 0x122   : > { %s239_s3 = sld [smem:[#allocation5]] (!%p376_p6) }
 0x123   : > { %238 = sbr.rel (%p376_p6) target bundleno = 420 (0x1a4), region = 52  ;;  %s377_s4 = sld [smem:[#allocation5 + $0x1]] (!%p376_p6) }
 0x128   : > { %v240_v42 = vstv %s239_s3  ;;  %v247_v46 = vld [vmem:[#allocation6] sm:$0xff]  ;;  %v248_v47 = vld [vmem:[#allocation6 + $0x8] sm:$0xff]  ;;  %v252_v53 = vld [vmem:[#allocation9] sm:$0xff] }
 0x129   : > { %451 = vrcp.f32 %v240_v42  ;;  %v244_v43 = vstv %s377_s4  ;;  %v253_v55 = vld [vmem:[#allocation9 + $0x8] sm:$0xff] }
 0x12a   : > { %453 = vrcp.f32 %v244_v43  ;;  %v271_v12 = vld [vmem:[#allocation4] sm:$0x1] }
 0x136   : > { %v452_v44 = vpop.eup %451 }
 0x137   : > { %v454_v45 = vpop.eup %453  ;;  %389 = vpush %v452_v44 }
 0x138   : > { %391 = vpush %v454_v45 }
 0x168   : > { %s390_s5 = spop %389 }
 0x169   : > { %v249_v48 = vstv %s390_s5  ;;  %s392_s6 = spop %391 }
 0x16a   : > { %v250_v49 = vmul.f32 %v249_v48, %v247_v46  ;;  %v251_v50 = vmul.f32 %v249_v48, %v248_v47  ;;  %v254_v54 = vstv %s392_s6 }
 0x16b   : > { %v255_v56 = vmul.f32 %v254_v54, %v252_v53  ;;  %v256_v57 = vmul.f32 %v254_v54, %v253_v55 }
 0x16c   : > { %v257_v51 = vadd.f32 2.220446e-16, %v250_v49  ;;  %v258_v52 = vadd.f32 2.220446e-16, %v251_v50 }
 0x16e   : > { %455 = vrcp.f32 %v257_v51 }
 0x16f   : > { %457 = vrcp.f32 %v258_v52 }
 0x17b   : > { %v456_v58 = vpop.eup %455 }
 0x17c   : > { %v458_v59 = vpop.eup %457  ;;  %v260_v60 = vmul.f32 %v456_v58, %v255_v56 }
 0x17d   : > { %v262_v61 = vmul.f32 %v458_v59, %v256_v57 }
 0x17e   : > { %v263_v62 = vadd.f32 2.220446e-16, %v260_v60 }
 0x17f   : > { %v264_v63 = vadd.f32 2.220446e-16, %v262_v61 }
 0x180   : > { %459 = vlog2.f32 %v263_v62 }
 0x181   : > { %461 = vlog2.f32 %v264_v63 }
 0x18d   : > { %v460_v0 = vpop.eup %459 }
 0x18e   : > { %v462_v1 = vpop.eup %461  ;;  %v266_v2 = vmul.f32 0.6931472, %v460_v0 }
 0x18f   : > { %v268_v3 = vmul.f32 0.6931472, %v462_v1 }
 0x190   : > { %v269_v4 = vmul.f32 %v266_v2, %v255_v56 }
 0x191   : > { %v270_v5 = vmul.f32 %v268_v3, %v256_v57 }
 0x193   : > { %v272_v6 = vadd.f32 %v270_v5, %v269_v4 }
 0x195   : > { %v273_v7 = vrot.slane %v272_v6, 4 }
 0x197   : > { %v274_v8 = vadd.f32 %v273_v7, %v272_v6 }
 0x199   : > { %v275_v9 = vrot.slane %v274_v8, 2 }
 0x19b   : > { %v276_v10 = vadd.f32 %v275_v9, %v274_v8 }
 0x19d   : > { %v277_v11 = vrot.slane %v276_v10, 1 }
 0x19f   : > { %v278_v13 = vadd.f32 %v277_v11, %v276_v10 }
 0x1a1   : > { %v279_v14 = vadd.f32 %v278_v13, %v271_v12 }
 0x1a3   : > { %280 = vst [vmem:[#allocation4] sm:$0x1] %v279_v14 }
 0x1a4 PF: > { %284 = sbr.rel (!%p235_p4) target bundleno = 629 (0x275), region = 56  ;;  %vm286_vm1 = vcmask (%p235_p4), 1040384  }
 0x1aa   : > { %v285_v15 = vld [vmem:[#allocation4] sm:$0x1] }
 0x1ab   : > { %v287_v16 = vsel %vm286_vm1, %v285_v15, 0.0 }
 0x1ac   : > { %288 = vadd.xlane.f32.xlu0 %v287_v16 }
 0x235   : > { %v289_v17 = vpop.xlane.xlu0 %288 }
 0x236   : > { %v290_v18 = vrot.slane %v289_v17, 4 }
 0x238   : > { %v291_v19 = vadd.f32 %v290_v18, %v289_v17 }
 0x23a   : > { %v292_v20 = vrot.slane %v291_v19, 2 }
 0x23c   : > { %v293_v21 = vadd.f32 %v292_v20, %v291_v19 }
 0x23e   : > { %v294_v22 = vrot.slane %v293_v21, 1 }
 0x240   : > { %v295_v23 = vadd.f32 %v294_v22, %v293_v21 }
 0x242   : > { %393 = vpush %v295_v23 }
 0x273   : > { %s394_s7 = spop %393 }
 0x274   : > { %298 = sst [smem:[#allocation11]] %s394_s7 }
 0x275 PF: > { %p418_p12 = scmp.eq.s32.totalorder %s367_s12, 1  ;;  %s567_s8 = smov [#allocation11]  }
 0x277   : > { %404 = dma.smem_to_hbm (%p418_p12), %s567_s8, 16, %s676_s2, [#allocation8]  }
 0x278   : > { %546 = dma.done.wait (%p418_p12), [#allocation8], 16  }
 0x279   : > { %548 = vsyncadd (%p418_p12), [#allocation8], 4294967280 }
 0x27a   : > { %312 = sfence }
 0x27b PF: > { %s15_s11 = sadd.s32 1, %s559_s11   ;;  %s680_s9 = smov %s555_s10 }
 0x27c   : > { %p12_p13 = scmp.ge.s32.totalorder %s15_s11, 4   ;;  %s681_s10 = smov %s683_s13 }
 0x27e   :  { %14 = sbr.rel (!%p12_p13) target bundleno = 4 (0x4), region = 86 }
 0x283   :  { %318 = vsyncpa [#allocation7], 1 }
 0x284   :  { %320 = vsyncpa [#allocation7 + $0x1], 1 }
 0x285   :  { %321 = vsyncpa [#allocation10], 1 }
 0x286   :  { %322 = vsyncpa [#allocation8], 1 }
 0x287   :  { %324 = vsyncpa [#allocation8 + $0x1], 1 }

</bundles_post_ra>
